<compile_context>
chip_gen: v6e
topology: v6e:2x2x1
jax: 0.10.0
libtpu: 0.0.40
codegen_flags: <defaults>
</compile_context>

<pallas_src>
import jax
import jax.numpy as jnp
import numpy as np
from jax.experimental import pallas as pl
from jax.experimental.pallas import tpu as pltpu


def _multi_lstm_kernel(xin_ref, whh_ref, h_out_ref):
    # xin_ref : (S, B, 16H) f32  per-step input gate pre-activations
    #                            (scal * embWih + bias), series packed along
    #                            lanes, g-gate block pre-scaled by 2.
    # whh_ref : (4H, 16H)        block-diagonal (per-series) W_hh^T, g-gate
    #                            columns pre-scaled by 2; possibly bf16.
    # h_out   : (B, 4H) f32      final hidden state, lane-dense, series order
    #                            [week | twoweek | threeweek | month].
    S, B, _ = xin_ref.shape
    H4 = whh_ref.shape[0]

    whh = whh_ref[...]                       # vreg-resident for the whole loop
    h = jnp.zeros((B, H4), jnp.float32)
    c = jnp.zeros((B, H4), jnp.float32)

    # Fully-unrolled serial recurrence (S static & small).  One MXU matmul,
    # one full-width sigmoid and one tanh(c) per step; everything else is VPU
    # filler under their latency.
    # TODO(synk): if S grows beyond ~16-32 switch to lax.fori_loop(unroll=k).
    # TODO(synk): if the bundle dump shows W_hh re-pushed every step, drive the
    # MXU explicitly (pltpu.matmul_push_rhs once + matmul_acc_lhs/pop per step).
    for t in range(S):
        gates = xin_ref[t] + jnp.dot(h.astype(whh.dtype), whh,
                                     preferred_element_type=jnp.float32)  # (B,16H)
        sig = jax.nn.sigmoid(gates)                 # single full-width EUP push
        i_g = sig[:, 0 * H4:1 * H4]
        f_g = sig[:, 1 * H4:2 * H4]
        g_g = 2.0 * sig[:, 2 * H4:3 * H4] - 1.0     # == tanh(g pre-act), exact
        o_g = sig[:, 3 * H4:4 * H4]
        c = f_g * c + i_g * g_g
        h = o_g * jnp.tanh(c)

    h_out_ref[...] = h


def multi_lstm_forward(input_week, input_twoweek, input_threeweek, input_month,
                       id_feature, params, *, recurrent_matmul_dtype=jnp.bfloat16):
    """Pallas implementation of MultiLstm.forward -> (final2, final)."""
    B, S, F = input_week.shape
    H = params["embedding"].shape[1]

    # ---- wrapper-side one-time prep (rank-1 projection + weight packing) ----
    x4 = jnp.stack([input_week, input_twoweek, input_threeweek, input_month],
                   axis=0).astype(jnp.float32)                      # (4, B, S, F)
    attn = jax.nn.softmax(params["feature_attn"].astype(jnp.float32))   # (F,)
    scal4 = jnp.einsum("nbsf,f->nbs", x4, attn)                     # (4, B, S)

    emb = params["embedding"].astype(jnp.float32)                   # (1, H)
    wih_t = params["w_ih"].T.astype(jnp.float32)                    # (H, 4H)
    embwih = (emb @ wih_t).reshape(4, H)                            # (gate, H)
    bias = (params["b_ih"] + params["b_hh"]).astype(jnp.float32).reshape(4, H)
    # tanh(x) = 2*sigmoid(2x) - 1: pre-scale the g-gate block by 2 so the
    # kernel needs only one full-width sigmoid per step.
    embwih = embwih.at[2].multiply(2.0)
    bias = bias.at[2].multiply(2.0)

    whh_t = params["w_hh"].T.astype(jnp.float32).reshape(H, 4, H)   # (H, gate, H)
    whh_t = whh_t.at[:, 2, :].multiply(2.0)

    # Lane-packed layouts: state (B, 4H) = [s0|s1|s2|s3]; gate pre-acts
    # (B, 16H) = [i: s0..s3 | f: s0..s3 | g: s0..s3 | o: s0..s3].
    eye4 = jnp.eye(4, dtype=jnp.float32)
    E = (eye4[:, None, :, None] * embwih[None, :, None, :]).reshape(4, 16 * H)
    bias_packed = jnp.broadcast_to(bias[:, None, :], (4, 4, H)).reshape(16 * H)
    whh_packed = (eye4[:, None, None, :, None]
                  * whh_t[None, :, :, None, :]).reshape(4 * H, 16 * H)

    # Per-step input contribution, precomputed so the kernel's serial chain has
    # no per-step lane extract / broadcast — just one contiguous load.
    x_in = jnp.einsum("sbt,sc->tbc", scal4, E) + bias_packed        # (S, B, 16H)

    vmem = pl.BlockSpec(memory_space=pltpu.MemorySpace.VMEM)
    # Single un-gridded call: all operands are a handful of (8,128) tiles and a
    # grid would only add per-step overhead on single-TC v5e/v6e.
    # TODO(synk): for production batch sizes add a "parallel" grid over B
    # (2x on v7x megacore) and re-budget against v7x's 64 MiB VMEM.
    h_packed = pl.pallas_call(
        _multi_lstm_kernel,
        out_shape=jax.ShapeDtypeStruct((B, 4 * H), jnp.float32),
        in_specs=[vmem, vmem],
        out_specs=vmem,
    )(x_in, whh_packed.astype(recurrent_matmul_dtype))              # (B, 4H)

    # ---- wrapper-side epilogue (ragged concat + 2-lane classifier) ----------
    # h_packed columns are already [week | twoweek | threeweek | month].
    final = jnp.concatenate([h_packed, id_feature.astype(jnp.float32)], axis=-1)
    logits = (final @ params["clf_w"].T.astype(jnp.float32)
              + params["clf_b"].astype(jnp.float32))
    final2 = jax.nn.softmax(logits, axis=-1)
    return final2, final


# ---------------------------------------------------------------------------
# Pure-JAX reference (mirrors the PyTorch forward op-for-op) for validation.
# ---------------------------------------------------------------------------
def _reference_forward(iw, i2w, i3w, im, idf, params):
    emb = params["embedding"]                                       # (1, H)
    attn = jax.nn.softmax(params["feature_attn"])                   # (F,)
    w_ih, w_hh = params["w_ih"], params["w_hh"]                     # (4H, H)
    b = params["b_ih"] + params["b_hh"]                             # (4H,)
    H = emb.shape[1]

    def project(x):                                                 # (B,S,F) -> (B,S,H)
        y = x[..., None] @ emb                                      # (B,S,F,H)
        y = jnp.swapaxes(y, -1, -2) @ attn                          # (B,S,H)
        return y

    def lstm(x):                                                    # (B,S,H) -> final h
        Bb = x.shape[0]
        h = jnp.zeros((Bb, H), jnp.float32)
        c = jnp.zeros((Bb, H), jnp.float32)
        for t in range(x.shape[1]):
            g = x[:, t] @ w_ih.T + h @ w_hh.T + b
            i_g = jax.nn.sigmoid(g[:, :H])
            f_g = jax.nn.sigmoid(g[:, H:2 * H])
            g_g = jnp.tanh(g[:, 2 * H:3 * H])
            o_g = jax.nn.sigmoid(g[:, 3 * H:])
            c = f_g * c + i_g * g_g
            h = o_g * jnp.tanh(c)
        return h

    finals = [lstm(project(v)) for v in (iw, i2w, i3w, im)]
    final = jnp.concatenate(finals + [idf], axis=-1)
    logits = final @ params["clf_w"].T + params["clf_b"]
    return jax.nn.softmax(logits, axis=-1), final


if __name__ == "__main__":
    B, S, F, H, ID = 2, 8, 4, 32, 8

    key = jax.random.PRNGKey(0)
    keys = jax.random.split(key, 12)
    params = {
        "embedding": jax.random.uniform(keys[0], (1, H), jnp.float32),
        "feature_attn": jax.random.uniform(keys[1], (F,), jnp.float32),
        "w_ih": jax.random.normal(keys[2], (4 * H, H), jnp.float32) * 0.1,
        "w_hh": jax.random.normal(keys[3], (4 * H, H), jnp.float32) * 0.1,
        "b_ih": jax.random.normal(keys[4], (4 * H,), jnp.float32) * 0.1,
        "b_hh": jax.random.normal(keys[5], (4 * H,), jnp.float32) * 0.1,
        "clf_w": jax.random.normal(keys[6], (2, 4 * H + ID), jnp.float32) * 0.1,
        "clf_b": jax.random.normal(keys[7], (2,), jnp.float32) * 0.1,
    }

    input_week = jax.random.normal(keys[8], (B, S, F), jnp.float32)
    input_twoweek = jax.random.normal(keys[9], (B, S, F), jnp.float32)
    input_threeweek = jax.random.normal(keys[10], (B, S, F), jnp.float32)
    input_month = jax.random.normal(keys[11], (B, S, F), jnp.float32)
    id_feature = jax.random.normal(jax.random.PRNGKey(123), (B, ID), jnp.float32)

    ref2, ref = _reference_forward(
        input_week, input_twoweek, input_threeweek, input_month, id_feature, params)

    # Default fast path: bf16 recurrent matmul (f32 accumulate).  Tolerance is
    # loosened accordingly (bf16 weight/operand rounding drifts over S steps).
    final2, final = multi_lstm_forward(
        input_week, input_twoweek, input_threeweek, input_month, id_feature, params)
    jax.block_until_ready((final2, final))
    np.testing.assert_allclose(np.asarray(final), np.asarray(ref), rtol=5e-2, atol=5e-2)
    np.testing.assert_allclose(np.asarray(final2), np.asarray(ref2), rtol=5e-2, atol=5e-2)

    # Bit-faithful path: f32 recurrent matmul matches the PyTorch-style
    # reference tightly (tanh-via-sigmoid identity is exact up to ulp).
    final2_f32, final_f32 = multi_lstm_forward(
        input_week, input_twoweek, input_threeweek, input_month, id_feature, params,
        recurrent_matmul_dtype=jnp.float32)
    jax.block_until_ready((final2_f32, final_f32))
    np.testing.assert_allclose(np.asarray(final_f32), np.asarray(ref), rtol=1e-4, atol=1e-4)
    np.testing.assert_allclose(np.asarray(final2_f32), np.asarray(ref2), rtol=1e-4, atol=1e-4)

    print("KERNEL_OK")
</pallas_src>

<mosaic_0001>
module attributes {stable_mosaic.version = 11 : i64} {
  func.func @_multi_lstm_kernel(%arg0: memref<8x2x512xf32, #tpu.memory_space<vmem>>, %arg1: memref<128x512xbf16, #tpu.memory_space<vmem>>, %arg2: memref<2x128xf32, #tpu.memory_space<vmem>>) attributes {dimension_semantics = [], scalar_prefetch = 0 : i64, scratch_operands = 0 : i64, tpu.core_type = #tpu.core_type<tc>} {
    %c0 = arith.constant 0 : index
    %c0_0 = arith.constant 0 : index
    %0 = vector.load %arg1[%c0, %c0_0] : memref<128x512xbf16, #tpu.memory_space<vmem>>, vector<128x512xbf16>
    %cst = arith.constant 0.000000e+00 : f32
    %1 = vector.broadcast %cst : f32 to vector<2x128xf32>
    %cst_1 = arith.constant 0.000000e+00 : f32
    %2 = vector.broadcast %cst_1 : f32 to vector<2x128xf32>
    %c0_2 = arith.constant 0 : index
    %c0_3 = arith.constant 0 : index
    %c0_4 = arith.constant 0 : index
    %3 = vector.load %arg0[%c0_2, %c0_3, %c0_4] : memref<8x2x512xf32, #tpu.memory_space<vmem>>, vector<1x2x512xf32>
    %4 = vector.shape_cast %3 : vector<1x2x512xf32> to vector<2x512xf32>
    %5 = arith.truncf %1 : vector<2x128xf32> to vector<2x128xbf16>
    %cst_5 = arith.constant dense<0.000000e+00> : vector<2x512xf32>
    %6 = tpu.matmul %5, %0, %cst_5 {dimension_numbers = #tpu.dot_dimension_numbers<[1], [0], [0], [1], [0, 0, 1, 1], [], []>} : vector<2x128xbf16>, vector<128x512xbf16>, vector<2x512xf32> -> vector<2x512xf32>
    %7 = arith.addf %4, %6 : vector<2x512xf32>
    %8 = arith.negf %7 : vector<2x512xf32>
    %9 = math.exp %8 : vector<2x512xf32>
    %cst_6 = arith.constant 1.000000e+00 : f32
    %10 = vector.broadcast %cst_6 : f32 to vector<2x512xf32>
    %11 = arith.addf %10, %9 : vector<2x512xf32>
    %12 = arith.divf %10, %11 : vector<2x512xf32>
    %13 = vector.extract_strided_slice %12 {offsets = [0, 0], sizes = [2, 128], strides = [1, 1]} : vector<2x512xf32> to vector<2x128xf32>
    %14 = vector.extract_strided_slice %12 {offsets = [0, 128], sizes = [2, 128], strides = [1, 1]} : vector<2x512xf32> to vector<2x128xf32>
    %15 = vector.extract_strided_slice %12 {offsets = [0, 256], sizes = [2, 128], strides = [1, 1]} : vector<2x512xf32> to vector<2x128xf32>
    %cst_7 = arith.constant 2.000000e+00 : f32
    %16 = vector.broadcast %cst_7 : f32 to vector<2x128xf32>
    %17 = arith.mulf %16, %15 : vector<2x128xf32>
    %cst_8 = arith.constant 1.000000e+00 : f32
    %18 = vector.broadcast %cst_8 : f32 to vector<2x128xf32>
    %19 = arith.subf %17, %18 : vector<2x128xf32>
    %20 = vector.extract_strided_slice %12 {offsets = [0, 384], sizes = [2, 128], strides = [1, 1]} : vector<2x512xf32> to vector<2x128xf32>
    %21 = arith.mulf %14, %2 : vector<2x128xf32>
    %22 = arith.mulf %13, %19 : vector<2x128xf32>
    %23 = arith.addf %21, %22 : vector<2x128xf32>
    %24 = math.tanh %23 : vector<2x128xf32>
    %25 = arith.mulf %20, %24 : vector<2x128xf32>
    %c1 = arith.constant 1 : index
    %c0_9 = arith.constant 0 : index
    %c0_10 = arith.constant 0 : index
    %26 = vector.load %arg0[%c1, %c0_9, %c0_10] : memref<8x2x512xf32, #tpu.memory_space<vmem>>, vector<1x2x512xf32>
    %27 = vector.shape_cast %26 : vector<1x2x512xf32> to vector<2x512xf32>
    %28 = arith.truncf %25 : vector<2x128xf32> to vector<2x128xbf16>
    %cst_11 = arith.constant dense<0.000000e+00> : vector<2x512xf32>
    %29 = tpu.matmul %28, %0, %cst_11 {dimension_numbers = #tpu.dot_dimension_numbers<[1], [0], [0], [1], [0, 0, 1, 1], [], []>} : vector<2x128xbf16>, vector<128x512xbf16>, vector<2x512xf32> -> vector<2x512xf32>
    %30 = arith.addf %27, %29 : vector<2x512xf32>
    %31 = arith.negf %30 : vector<2x512xf32>
    %32 = math.exp %31 : vector<2x512xf32>
    %cst_12 = arith.constant 1.000000e+00 : f32
    %33 = vector.broadcast %cst_12 : f32 to vector<2x512xf32>
    %34 = arith.addf %33, %32 : vector<2x512xf32>
    %35 = arith.divf %33, %34 : vector<2x512xf32>
    %36 = vector.extract_strided_slice %35 {offsets = [0, 0], sizes = [2, 128], strides = [1, 1]} : vector<2x512xf32> to vector<2x128xf32>
    %37 = vector.extract_strided_slice %35 {offsets = [0, 128], sizes = [2, 128], strides = [1, 1]} : vector<2x512xf32> to vector<2x128xf32>
    %38 = vector.extract_strided_slice %35 {offsets = [0, 256], sizes = [2, 128], strides = [1, 1]} : vector<2x512xf32> to vector<2x128xf32>
    %cst_13 = arith.constant 2.000000e+00 : f32
    %39 = vector.broadcast %cst_13 : f32 to vector<2x128xf32>
    %40 = arith.mulf %39, %38 : vector<2x128xf32>
    %cst_14 = arith.constant 1.000000e+00 : f32
    %41 = vector.broadcast %cst_14 : f32 to vector<2x128xf32>
    %42 = arith.subf %40, %41 : vector<2x128xf32>
    %43 = vector.extract_strided_slice %35 {offsets = [0, 384], sizes = [2, 128], strides = [1, 1]} : vector<2x512xf32> to vector<2x128xf32>
    %44 = arith.mulf %37, %23 : vector<2x128xf32>
    %45 = arith.mulf %36, %42 : vector<2x128xf32>
    %46 = arith.addf %44, %45 : vector<2x128xf32>
    %47 = math.tanh %46 : vector<2x128xf32>
    %48 = arith.mulf %43, %47 : vector<2x128xf32>
    %c2 = arith.constant 2 : index
    %c0_15 = arith.constant 0 : index
    %c0_16 = arith.constant 0 : index
    %49 = vector.load %arg0[%c2, %c0_15, %c0_16] : memref<8x2x512xf32, #tpu.memory_space<vmem>>, vector<1x2x512xf32>
    %50 = vector.shape_cast %49 : vector<1x2x512xf32> to vector<2x512xf32>
    %51 = arith.truncf %48 : vector<2x128xf32> to vector<2x128xbf16>
    %cst_17 = arith.constant dense<0.000000e+00> : vector<2x512xf32>
    %52 = tpu.matmul %51, %0, %cst_17 {dimension_numbers = #tpu.dot_dimension_numbers<[1], [0], [0], [1], [0, 0, 1, 1], [], []>} : vector<2x128xbf16>, vector<128x512xbf16>, vector<2x512xf32> -> vector<2x512xf32>
    %53 = arith.addf %50, %52 : vector<2x512xf32>
    %54 = arith.negf %53 : vector<2x512xf32>
    %55 = math.exp %54 : vector<2x512xf32>
    %cst_18 = arith.constant 1.000000e+00 : f32
    %56 = vector.broadcast %cst_18 : f32 to vector<2x512xf32>
    %57 = arith.addf %56, %55 : vector<2x512xf32>
    %58 = arith.divf %56, %57 : vector<2x512xf32>
    %59 = vector.extract_strided_slice %58 {offsets = [0, 0], sizes = [2, 128], strides = [1, 1]} : vector<2x512xf32> to vector<2x128xf32>
    %60 = vector.extract_strided_slice %58 {offsets = [0, 128], sizes = [2, 128], strides = [1, 1]} : vector<2x512xf32> to vector<2x128xf32>
    %61 = vector.extract_strided_slice %58 {offsets = [0, 256], sizes = [2, 128], strides = [1, 1]} : vector<2x512xf32> to vector<2x128xf32>
    %cst_19 = arith.constant 2.000000e+00 : f32
    %62 = vector.broadcast %cst_19 : f32 to vector<2x128xf32>
    %63 = arith.mulf %62, %61 : vector<2x128xf32>
    %cst_20 = arith.constant 1.000000e+00 : f32
    %64 = vector.broadcast %cst_20 : f32 to vector<2x128xf32>
    %65 = arith.subf %63, %64 : vector<2x128xf32>
    %66 = vector.extract_strided_slice %58 {offsets = [0, 384], sizes = [2, 128], strides = [1, 1]} : vector<2x512xf32> to vector<2x128xf32>
    %67 = arith.mulf %60, %46 : vector<2x128xf32>
    %68 = arith.mulf %59, %65 : vector<2x128xf32>
    %69 = arith.addf %67, %68 : vector<2x128xf32>
    %70 = math.tanh %69 : vector<2x128xf32>
    %71 = arith.mulf %66, %70 : vector<2x128xf32>
    %c3 = arith.constant 3 : index
    %c0_21 = arith.constant 0 : index
    %c0_22 = arith.constant 0 : index
    %72 = vector.load %arg0[%c3, %c0_21, %c0_22] : memref<8x2x512xf32, #tpu.memory_space<vmem>>, vector<1x2x512xf32>
    %73 = vector.shape_cast %72 : vector<1x2x512xf32> to vector<2x512xf32>
    %74 = arith.truncf %71 : vector<2x128xf32> to vector<2x128xbf16>
    %cst_23 = arith.constant dense<0.000000e+00> : vector<2x512xf32>
    %75 = tpu.matmul %74, %0, %cst_23 {dimension_numbers = #tpu.dot_dimension_numbers<[1], [0], [0], [1], [0, 0, 1, 1], [], []>} : vector<2x128xbf16>, vector<128x512xbf16>, vector<2x512xf32> -> vector<2x512xf32>
    %76 = arith.addf %73, %75 : vector<2x512xf32>
    %77 = arith.negf %76 : vector<2x512xf32>
    %78 = math.exp %77 : vector<2x512xf32>
    %cst_24 = arith.constant 1.000000e+00 : f32
    %79 = vector.broadcast %cst_24 : f32 to vector<2x512xf32>
    %80 = arith.addf %79, %78 : vector<2x512xf32>
    %81 = arith.divf %79, %80 : vector<2x512xf32>
    %82 = vector.extract_strided_slice %81 {offsets = [0, 0], sizes = [2, 128], strides = [1, 1]} : vector<2x512xf32> to vector<2x128xf32>
    %83 = vector.extract_strided_slice %81 {offsets = [0, 128], sizes = [2, 128], strides = [1, 1]} : vector<2x512xf32> to vector<2x128xf32>
    %84 = vector.extract_strided_slice %81 {offsets = [0, 256], sizes = [2, 128], strides = [1, 1]} : vector<2x512xf32> to vector<2x128xf32>
    %cst_25 = arith.constant 2.000000e+00 : f32
    %85 = vector.broadcast %cst_25 : f32 to vector<2x128xf32>
    %86 = arith.mulf %85, %84 : vector<2x128xf32>
    %cst_26 = arith.constant 1.000000e+00 : f32
    %87 = vector.broadcast %cst_26 : f32 to vector<2x128xf32>
    %88 = arith.subf %86, %87 : vector<2x128xf32>
    %89 = vector.extract_strided_slice %81 {offsets = [0, 384], sizes = [2, 128], strides = [1, 1]} : vector<2x512xf32> to vector<2x128xf32>
    %90 = arith.mulf %83, %69 : vector<2x128xf32>
    %91 = arith.mulf %82, %88 : vector<2x128xf32>
    %92 = arith.addf %90, %91 : vector<2x128xf32>
    %93 = math.tanh %92 : vector<2x128xf32>
    %94 = arith.mulf %89, %93 : vector<2x128xf32>
    %c4 = arith.constant 4 : index
    %c0_27 = arith.constant 0 : index
    %c0_28 = arith.constant 0 : index
    %95 = vector.load %arg0[%c4, %c0_27, %c0_28] : memref<8x2x512xf32, #tpu.memory_space<vmem>>, vector<1x2x512xf32>
    %96 = vector.shape_cast %95 : vector<1x2x512xf32> to vector<2x512xf32>
    %97 = arith.truncf %94 : vector<2x128xf32> to vector<2x128xbf16>
    %cst_29 = arith.constant dense<0.000000e+00> : vector<2x512xf32>
    %98 = tpu.matmul %97, %0, %cst_29 {dimension_numbers = #tpu.dot_dimension_numbers<[1], [0], [0], [1], [0, 0, 1, 1], [], []>} : vector<2x128xbf16>, vector<128x512xbf16>, vector<2x512xf32> -> vector<2x512xf32>
    %99 = arith.addf %96, %98 : vector<2x512xf32>
    %100 = arith.negf %99 : vector<2x512xf32>
    %101 = math.exp %100 : vector<2x512xf32>
    %cst_30 = arith.constant 1.000000e+00 : f32
    %102 = vector.broadcast %cst_30 : f32 to vector<2x512xf32>
    %103 = arith.addf %102, %101 : vector<2x512xf32>
    %104 = arith.divf %102, %103 : vector<2x512xf32>
    %105 = vector.extract_strided_slice %104 {offsets = [0, 0], sizes = [2, 128], strides = [1, 1]} : vector<2x512xf32> to vector<2x128xf32>
    %106 = vector.extract_strided_slice %104 {offsets = [0, 128], sizes = [2, 128], strides = [1, 1]} : vector<2x512xf32> to vector<2x128xf32>
    %107 = vector.extract_strided_slice %104 {offsets = [0, 256], sizes = [2, 128], strides = [1, 1]} : vector<2x512xf32> to vector<2x128xf32>
    %cst_31 = arith.constant 2.000000e+00 : f32
    %108 = vector.broadcast %cst_31 : f32 to vector<2x128xf32>
    %109 = arith.mulf %108, %107 : vector<2x128xf32>
    %cst_32 = arith.constant 1.000000e+00 : f32
    %110 = vector.broadcast %cst_32 : f32 to vector<2x128xf32>
    %111 = arith.subf %109, %110 : vector<2x128xf32>
    %112 = vector.extract_strided_slice %104 {offsets = [0, 384], sizes = [2, 128], strides = [1, 1]} : vector<2x512xf32> to vector<2x128xf32>
    %113 = arith.mulf %106, %92 : vector<2x128xf32>
    %114 = arith.mulf %105, %111 : vector<2x128xf32>
    %115 = arith.addf %113, %114 : vector<2x128xf32>
    %116 = math.tanh %115 : vector<2x128xf32>
    %117 = arith.mulf %112, %116 : vector<2x128xf32>
    %c5 = arith.constant 5 : index
    %c0_33 = arith.constant 0 : index
    %c0_34 = arith.constant 0 : index
    %118 = vector.load %arg0[%c5, %c0_33, %c0_34] : memref<8x2x512xf32, #tpu.memory_space<vmem>>, vector<1x2x512xf32>
    %119 = vector.shape_cast %118 : vector<1x2x512xf32> to vector<2x512xf32>
    %120 = arith.truncf %117 : vector<2x128xf32> to vector<2x128xbf16>
    %cst_35 = arith.constant dense<0.000000e+00> : vector<2x512xf32>
    %121 = tpu.matmul %120, %0, %cst_35 {dimension_numbers = #tpu.dot_dimension_numbers<[1], [0], [0], [1], [0, 0, 1, 1], [], []>} : vector<2x128xbf16>, vector<128x512xbf16>, vector<2x512xf32> -> vector<2x512xf32>
    %122 = arith.addf %119, %121 : vector<2x512xf32>
    %123 = arith.negf %122 : vector<2x512xf32>
    %124 = math.exp %123 : vector<2x512xf32>
    %cst_36 = arith.constant 1.000000e+00 : f32
    %125 = vector.broadcast %cst_36 : f32 to vector<2x512xf32>
    %126 = arith.addf %125, %124 : vector<2x512xf32>
    %127 = arith.divf %125, %126 : vector<2x512xf32>
    %128 = vector.extract_strided_slice %127 {offsets = [0, 0], sizes = [2, 128], strides = [1, 1]} : vector<2x512xf32> to vector<2x128xf32>
    %129 = vector.extract_strided_slice %127 {offsets = [0, 128], sizes = [2, 128], strides = [1, 1]} : vector<2x512xf32> to vector<2x128xf32>
    %130 = vector.extract_strided_slice %127 {offsets = [0, 256], sizes = [2, 128], strides = [1, 1]} : vector<2x512xf32> to vector<2x128xf32>
    %cst_37 = arith.constant 2.000000e+00 : f32
    %131 = vector.broadcast %cst_37 : f32 to vector<2x128xf32>
    %132 = arith.mulf %131, %130 : vector<2x128xf32>
    %cst_38 = arith.constant 1.000000e+00 : f32
    %133 = vector.broadcast %cst_38 : f32 to vector<2x128xf32>
    %134 = arith.subf %132, %133 : vector<2x128xf32>
    %135 = vector.extract_strided_slice %127 {offsets = [0, 384], sizes = [2, 128], strides = [1, 1]} : vector<2x512xf32> to vector<2x128xf32>
    %136 = arith.mulf %129, %115 : vector<2x128xf32>
    %137 = arith.mulf %128, %134 : vector<2x128xf32>
    %138 = arith.addf %136, %137 : vector<2x128xf32>
    %139 = math.tanh %138 : vector<2x128xf32>
    %140 = arith.mulf %135, %139 : vector<2x128xf32>
    %c6 = arith.constant 6 : index
    %c0_39 = arith.constant 0 : index
    %c0_40 = arith.constant 0 : index
    %141 = vector.load %arg0[%c6, %c0_39, %c0_40] : memref<8x2x512xf32, #tpu.memory_space<vmem>>, vector<1x2x512xf32>
    %142 = vector.shape_cast %141 : vector<1x2x512xf32> to vector<2x512xf32>
    %143 = arith.truncf %140 : vector<2x128xf32> to vector<2x128xbf16>
    %cst_41 = arith.constant dense<0.000000e+00> : vector<2x512xf32>
    %144 = tpu.matmul %143, %0, %cst_41 {dimension_numbers = #tpu.dot_dimension_numbers<[1], [0], [0], [1], [0, 0, 1, 1], [], []>} : vector<2x128xbf16>, vector<128x512xbf16>, vector<2x512xf32> -> vector<2x512xf32>
    %145 = arith.addf %142, %144 : vector<2x512xf32>
    %146 = arith.negf %145 : vector<2x512xf32>
    %147 = math.exp %146 : vector<2x512xf32>
    %cst_42 = arith.constant 1.000000e+00 : f32
    %148 = vector.broadcast %cst_42 : f32 to vector<2x512xf32>
    %149 = arith.addf %148, %147 : vector<2x512xf32>
    %150 = arith.divf %148, %149 : vector<2x512xf32>
    %151 = vector.extract_strided_slice %150 {offsets = [0, 0], sizes = [2, 128], strides = [1, 1]} : vector<2x512xf32> to vector<2x128xf32>
    %152 = vector.extract_strided_slice %150 {offsets = [0, 128], sizes = [2, 128], strides = [1, 1]} : vector<2x512xf32> to vector<2x128xf32>
    %153 = vector.extract_strided_slice %150 {offsets = [0, 256], sizes = [2, 128], strides = [1, 1]} : vector<2x512xf32> to vector<2x128xf32>
    %cst_43 = arith.constant 2.000000e+00 : f32
    %154 = vector.broadcast %cst_43 : f32 to vector<2x128xf32>
    %155 = arith.mulf %154, %153 : vector<2x128xf32>
    %cst_44 = arith.constant 1.000000e+00 : f32
    %156 = vector.broadcast %cst_44 : f32 to vector<2x128xf32>
    %157 = arith.subf %155, %156 : vector<2x128xf32>
    %158 = vector.extract_strided_slice %150 {offsets = [0, 384], sizes = [2, 128], strides = [1, 1]} : vector<2x512xf32> to vector<2x128xf32>
    %159 = arith.mulf %152, %138 : vector<2x128xf32>
    %160 = arith.mulf %151, %157 : vector<2x128xf32>
    %161 = arith.addf %159, %160 : vector<2x128xf32>
    %162 = math.tanh %161 : vector<2x128xf32>
    %163 = arith.mulf %158, %162 : vector<2x128xf32>
    %c7 = arith.constant 7 : index
    %c0_45 = arith.constant 0 : index
    %c0_46 = arith.constant 0 : index
    %164 = vector.load %arg0[%c7, %c0_45, %c0_46] : memref<8x2x512xf32, #tpu.memory_space<vmem>>, vector<1x2x512xf32>
    %165 = vector.shape_cast %164 : vector<1x2x512xf32> to vector<2x512xf32>
    %166 = arith.truncf %163 : vector<2x128xf32> to vector<2x128xbf16>
    %cst_47 = arith.constant dense<0.000000e+00> : vector<2x512xf32>
    %167 = tpu.matmul %166, %0, %cst_47 {dimension_numbers = #tpu.dot_dimension_numbers<[1], [0], [0], [1], [0, 0, 1, 1], [], []>} : vector<2x128xbf16>, vector<128x512xbf16>, vector<2x512xf32> -> vector<2x512xf32>
    %168 = arith.addf %165, %167 : vector<2x512xf32>
    %169 = arith.negf %168 : vector<2x512xf32>
    %170 = math.exp %169 : vector<2x512xf32>
    %cst_48 = arith.constant 1.000000e+00 : f32
    %171 = vector.broadcast %cst_48 : f32 to vector<2x512xf32>
    %172 = arith.addf %171, %170 : vector<2x512xf32>
    %173 = arith.divf %171, %172 : vector<2x512xf32>
    %174 = vector.extract_strided_slice %173 {offsets = [0, 0], sizes = [2, 128], strides = [1, 1]} : vector<2x512xf32> to vector<2x128xf32>
    %175 = vector.extract_strided_slice %173 {offsets = [0, 128], sizes = [2, 128], strides = [1, 1]} : vector<2x512xf32> to vector<2x128xf32>
    %176 = vector.extract_strided_slice %173 {offsets = [0, 256], sizes = [2, 128], strides = [1, 1]} : vector<2x512xf32> to vector<2x128xf32>
    %cst_49 = arith.constant 2.000000e+00 : f32
    %177 = vector.broadcast %cst_49 : f32 to vector<2x128xf32>
    %178 = arith.mulf %177, %176 : vector<2x128xf32>
    %cst_50 = arith.constant 1.000000e+00 : f32
    %179 = vector.broadcast %cst_50 : f32 to vector<2x128xf32>
    %180 = arith.subf %178, %179 : vector<2x128xf32>
    %181 = vector.extract_strided_slice %173 {offsets = [0, 384], sizes = [2, 128], strides = [1, 1]} : vector<2x512xf32> to vector<2x128xf32>
    %182 = arith.mulf %175, %161 : vector<2x128xf32>
    %183 = arith.mulf %174, %180 : vector<2x128xf32>
    %184 = arith.addf %182, %183 : vector<2x128xf32>
    %185 = math.tanh %184 : vector<2x128xf32>
    %186 = arith.mulf %181, %185 : vector<2x128xf32>
    %c0_51 = arith.constant 0 : index
    %c0_52 = arith.constant 0 : index
    %187 = vector.load %arg2[%c0_51, %c0_52] : memref<2x128xf32, #tpu.memory_space<vmem>>, vector<2x128xf32>
    tpu.vector_store %arg2[%c0_51, %c0_52], %186 {strides = array<i32>} : memref<2x128xf32, #tpu.memory_space<vmem>>, vector<2x128xf32>,
    return
  }
}

</mosaic_0001>

<bundles_post_ra>
// kernel: tpu_custom_call.1
= control target key start
LH: loop header
LB: loop body
LE: loop exit
PB: predicated region body
PF: predicated region fallthrough
CT: control target
= control target key end

     0   :  { %7 = vsyncpa [#allocation3], 0  ;;  %s1904_s0 = inlined_call_operand.hbm [shape: f32[8,2,512], index: 0, kind: input, shape index: {}]   ;;  %s1905_s1 = inlined_call_operand.hbm [shape: bf16[128,512], index: 1, kind: input, shape index: {}]   ;;  %s1906_s2 = inlined_call_operand.hbm [shape: f32[2,128], index: 2, kind: output, shape index: {}]  }
   0x1   :  { %8 = vsyncpa [#allocation6], 0 }
   0x2   :  { %9 = vsyncpa [#allocation4], 0  ;;  %s1493_s9 = smov [#allocation2]  }
   0x3   :  { %s15_s10 = sshll.u32 %s1493_s9, 4  ;;  %s16_s10 = int_to_ptr.vmem [resolvable:$true] %s15_s10 }
   0x4   :  { %s1435_s11 = scalar_lea.vmem %s16_s10, 1024  ;;  %p1440_p1 = scmp.lt.s32.totalorder %s16_s10, %s16_s10 }
   0x5   :  { %p1436_p0 = scmp.ne.s32.totalorder %s16_s10, %s1435_s11  ;;  %p1441_p2 = scmp.lt.s32.totalorder %s1435_s11, %s1435_s11 }
   0x7   :  { %p1442_p3 = por %p1441_p2, %p1440_p1 }
   0x9   :  { %p1443_p4 = pnand %p1442_p3, %p1436_p0 }
   0xb   :  { %1446 = shalt.err (!%p1443_p4)
}
   0xc   :  { %s1494_s12 = smov 128   ;;  %s1495_s13 = smov 8  }
   0xd   :  { %21 = dma.hbm_to_vmem [thread:$0]  %s1904_s0, 1024, %s16_s10, [#allocation3], %s1494_s12, %s1494_s12, %s1495_s13  }
   0xe   :  { %s1496_s16 = smov [#allocation5]  }
   0xf   :  { %s27_s17 = sshll.u32 %s1496_s16, 4  ;;  %s28_s17 = int_to_ptr.vmem [resolvable:$true] %s27_s17 }
  0x10   :  { %s1455_s18 = scalar_lea.vmem %s28_s17, 4096  ;;  %p1460_p6 = scmp.lt.s32.totalorder %s28_s17, %s28_s17 }
  0x11   :  { %p1456_p5 = scmp.ne.s32.totalorder %s28_s17, %s1455_s18  ;;  %p1461_p7 = scmp.lt.s32.totalorder %s1455_s18, %s1455_s18 }
  0x13   :  { %p1462_p8 = por %p1461_p7, %p1460_p6 }
  0x15   :  { %p1463_p9 = pnand %p1462_p8, %p1456_p5 }
  0x17   :  { %1466 = shalt.err (!%p1463_p9)
}
  0x18   :  { %s1497_s19 = smov 256   ;;  %s1498_s20 = smov 16  }
  0x19   :  { %33 = dma.hbm_to_vmem [thread:$0]  %s1905_s1, 4096, %s28_s17, [#allocation6], %s1497_s19, %s1497_s19, %s1498_s20  }
  0x1a   :  { %1487 = dma.done.wait [#allocation3], 1024  }
  0x1b   :  { %1488 = vsyncadd [#allocation3], 4294966272 }
  0x1c   :  { %1489 = dma.done.wait [#allocation6], 4096  }
  0x1d   :  { %1490 = vsyncadd [#allocation6], 4294963200  ;;  %v1499_v0 = vmov 0   ;;  %v1525_v1 = vld [vmem:[#allocation5 + $0xe4] ss:$16 sps:$4 sm:$0xff]   ;;  %v325_v35 = vlaneseq  ;;  %s1501_s0 = smov [#allocation7]  }
  0x1e   :  { %266 = vmatprep.mubr.bf16.mxu0 %v1499_v0  ;;  %307 = vmatprep.mubr.bf16.mxu1 %v1499_v0  ;;  %v1527_v2 = vld [vmem:[#allocation5 + $0xec] ss:$16 sps:$4 sm:$0xff]   ;;  %v1530_v3 = vld [vmem:[#allocation5 + $0xe0] ss:$16 sps:$4 sm:$0xff]   ;;  %v1532_v4 = vld [vmem:[#allocation5 + $0xe8] ss:$16 sps:$4 sm:$0xff]  }
  0x1f   :  { %234 = vmatprep.subr.bf16.mxu0 %v1525_v1  ;;  %275 = vmatprep.subr.bf16.mxu1 %v1527_v2  ;;  %v1535_v5 = vld [vmem:[#allocation5 + $0xc4] ss:$16 sps:$4 sm:$0xff]   ;;  %v1539_v6 = vld [vmem:[#allocation5 + $0xcc] ss:$16 sps:$4 sm:$0xff]   ;;  %v1541_v7 = vld [vmem:[#allocation5 + $0xc0] ss:$16 sps:$4 sm:$0xff]  }
  0x20   :  { %235 = vmatpush1.bf16.msra.mxu0 %v1530_v3  ;;  %276 = vmatpush1.bf16.msra.mxu1 %v1532_v4  ;;  %v1544_v8 = vld [vmem:[#allocation5 + $0xc8] ss:$16 sps:$4 sm:$0xff]   ;;  %v1547_v9 = vld [vmem:[#allocation5 + $0xa4] ss:$16 sps:$4 sm:$0xff]   ;;  %v1549_v10 = vld [vmem:[#allocation5 + $0xac] ss:$16 sps:$4 sm:$0xff]  }
  0x21   :  { %236 = vmatprep.subr.bf16.mxu0 %v1535_v5  ;;  %277 = vmatprep.subr.bf16.mxu1 %v1539_v6  ;;  %v1551_v11 = vld [vmem:[#allocation5 + $0xa0] ss:$16 sps:$4 sm:$0xff]   ;;  %v1553_v12 = vld [vmem:[#allocation5 + $0xa8] ss:$16 sps:$4 sm:$0xff]   ;;  %v1557_v13 = vld [vmem:[#allocation5 + $0x84] ss:$16 sps:$4 sm:$0xff]  }
  0x22   :  { %v1561_v14 = vld [vmem:[#allocation5 + $0x8c] ss:$16 sps:$4 sm:$0xff]   ;;  %v1563_v15 = vld [vmem:[#allocation5 + $0x80] ss:$16 sps:$4 sm:$0xff]   ;;  %v1567_v16 = vld [vmem:[#allocation5 + $0x88] ss:$16 sps:$4 sm:$0xff]  }
  0x23   :  { %v1569_v17 = vld [vmem:[#allocation5 + $0x64] ss:$16 sps:$4 sm:$0xff]   ;;  %v1573_v18 = vld [vmem:[#allocation5 + $0x6c] ss:$16 sps:$4 sm:$0xff]   ;;  %v1575_v19 = vld [vmem:[#allocation5 + $0x60] ss:$16 sps:$4 sm:$0xff]  }
  0x24   :  { %237 = vmatpush1.bf16.msra.mxu0 %v1541_v7  ;;  %278 = vmatpush1.bf16.msra.mxu1 %v1544_v8  ;;  %v1577_v20 = vld [vmem:[#allocation5 + $0x68] ss:$16 sps:$4 sm:$0xff]   ;;  %v1581_v21 = vld [vmem:[#allocation5 + $0x44] ss:$16 sps:$4 sm:$0xff]   ;;  %v1585_v22 = vld [vmem:[#allocation5 + $0x4c] ss:$16 sps:$4 sm:$0xff]  }
  0x25   :  { %238 = vmatprep.subr.bf16.mxu0 %v1547_v9  ;;  %279 = vmatprep.subr.bf16.mxu1 %v1549_v10  ;;  %v1589_v23 = vld [vmem:[#allocation5 + $0x40] ss:$16 sps:$4 sm:$0xff]   ;;  %v1591_v24 = vld [vmem:[#allocation5 + $0x48] ss:$16 sps:$4 sm:$0xff]   ;;  %v1595_v25 = vld [vmem:[#allocation5 + $0x24] ss:$16 sps:$4 sm:$0xff]  }
  0x26   :  { %v1597_v26 = vld [vmem:[#allocation5 + $0x2c] ss:$16 sps:$4 sm:$0xff]   ;;  %v1601_v27 = vld [vmem:[#allocation5 + $0x20] ss:$16 sps:$4 sm:$0xff]   ;;  %v1603_v28 = vld [vmem:[#allocation5 + $0x28] ss:$16 sps:$4 sm:$0xff]  }
  0x27   :  { %v1607_v29 = vld [vmem:[#allocation5 + $0x4] ss:$16 sps:$4 sm:$0xff]   ;;  %v1609_v30 = vld [vmem:[#allocation5 + $0xc] ss:$16 sps:$4 sm:$0xff]   ;;  %v1613_v31 = vld [vmem:[#allocation5] ss:$16 sps:$4 sm:$0xff]  }
  0x28   :  { %239 = vmatpush1.bf16.msra.mxu0 %v1551_v11  ;;  %280 = vmatpush1.bf16.msra.mxu1 %v1553_v12  ;;  %v1615_v32 = vld [vmem:[#allocation5 + $0x8] ss:$16 sps:$4 sm:$0xff]   ;;  %v1500_v33 = vmov 1983009808   ;;  %v326_v37 = vshrl.u32 %v325_v35, 7  ;;  %v73_v49 = vld [vmem:[#allocation2] sm:$0xff] }
  0x29   :  { %240 = vmatprep.subr.bf16.mxu0 %v1557_v13  ;;  %281 = vmatprep.subr.bf16.mxu1 %v1561_v14  ;;  %v323_v34 = vunpack.c.l.s4 %v1500_v33  ;;  %s1262_s1 = sshll.u32 %s1501_s0, 4  ;;  %s1263_s1 = int_to_ptr.vmem [resolvable:$true] %s1262_s1 }
  0x2a   :  { %s1467_s23 = scalar_lea.vmem %s1263_s1, 32  ;;  %p1472_p11 = scmp.lt.s32.totalorder %s1263_s1, %s1263_s1 }
  0x2b   :  { %v324_v36 = vunpack.c.0.s8 %v323_v34  ;;  %p1468_p10 = scmp.ne.s32.totalorder %s1263_s1, %s1467_s23  ;;  %p1473_p12 = scmp.lt.s32.totalorder %s1467_s23, %s1467_s23 }
  0x2c   :  { %241 = vmatpush1.bf16.msra.mxu0 %v1563_v15  ;;  %282 = vmatpush1.bf16.msra.mxu1 %v1567_v16 }
  0x2d   :  { %242 = vmatprep.subr.bf16.mxu0 %v1569_v17  ;;  %283 = vmatprep.subr.bf16.mxu1 %v1573_v18  ;;  %v1659_v40 = vsub.s32 %v324_v36, %v326_v37  ;;  %p1474_p13 = por %p1473_p12, %p1472_p11 }
  0x2f   :  { %p1475_p0 = pnand %p1474_p13, %p1468_p10 }
  0x30   :  { %243 = vmatpush1.bf16.msra.mxu0 %v1575_v19  ;;  %284 = vmatpush1.bf16.msra.mxu1 %v1577_v20 }
  0x31   :  { %244 = vmatprep.subr.bf16.mxu0 %v1581_v21  ;;  %285 = vmatprep.subr.bf16.mxu1 %v1585_v22 }
  0x34   :  { %245 = vmatpush1.bf16.msra.mxu0 %v1589_v23  ;;  %286 = vmatpush1.bf16.msra.mxu1 %v1591_v24 }
  0x35   :  { %246 = vmatprep.subr.bf16.mxu0 %v1595_v25  ;;  %287 = vmatprep.subr.bf16.mxu1 %v1597_v26 }
  0x38   :  { %247 = vmatpush1.bf16.msra.mxu0 %v1601_v27  ;;  %288 = vmatpush1.bf16.msra.mxu1 %v1603_v28 }
  0x39   :  { %248 = vmatprep.subr.bf16.mxu0 %v1607_v29  ;;  %289 = vmatprep.subr.bf16.mxu1 %v1609_v30 }
  0x3c   :  { %249 = vmatpush1.bf16.msra.mxu0 %v1613_v31  ;;  %290 = vmatpush1.bf16.msra.mxu1 %v1615_v32 }
  0x3d   :  { %362 = vmatprep.subr.bf16.mxu0 %v1525_v1  ;;  %403 = vmatprep.subr.bf16.mxu1 %v1527_v2 }
  0x3f   :  { %267 = vmatmul.mubr.bf16.vlgmr.msra.gmra.mxu0 %v1499_v0  ;;  %308 = vmatmul.mubr.bf16.vlgmr.msra.gmra.mxu1 %v1499_v0 }
  0x40   :  { %363 = vmatpush1.bf16.msra.mxu0 %v1530_v3  ;;  %404 = vmatpush1.bf16.msra.mxu1 %v1532_v4 }
  0x41   :  { %364 = vmatprep.subr.bf16.mxu0 %v1535_v5  ;;  %405 = vmatprep.subr.bf16.mxu1 %v1539_v6 }
  0x42   :  { %394 = vmatprep.mubr.bf16.mxu0 %v1499_v0  ;;  %435 = vmatprep.mubr.bf16.mxu1 %v1499_v0 }
  0x44   :  { %365 = vmatpush1.bf16.msra.mxu0 %v1541_v7  ;;  %406 = vmatpush1.bf16.msra.mxu1 %v1544_v8 }
  0x45   :  { %366 = vmatprep.subr.bf16.mxu0 %v1547_v9  ;;  %407 = vmatprep.subr.bf16.mxu1 %v1549_v10 }
  0x48   :  { %367 = vmatpush1.bf16.msra.mxu0 %v1551_v11  ;;  %408 = vmatpush1.bf16.msra.mxu1 %v1553_v12 }
  0x49   :  { %368 = vmatprep.subr.bf16.mxu0 %v1557_v13  ;;  %409 = vmatprep.subr.bf16.mxu1 %v1561_v14 }
  0x4c   :  { %369 = vmatpush1.bf16.msra.mxu0 %v1563_v15  ;;  %410 = vmatpush1.bf16.msra.mxu1 %v1567_v16 }
  0x4d   :  { %370 = vmatprep.subr.bf16.mxu0 %v1569_v17  ;;  %411 = vmatprep.subr.bf16.mxu1 %v1573_v18 }
  0x50   :  { %371 = vmatpush1.bf16.msra.mxu0 %v1575_v19  ;;  %412 = vmatpush1.bf16.msra.mxu1 %v1577_v20 }
  0x51   :  { %372 = vmatprep.subr.bf16.mxu0 %v1581_v21  ;;  %413 = vmatprep.subr.bf16.mxu1 %v1585_v22 }
  0x54   :  { %373 = vmatpush1.bf16.msra.mxu0 %v1589_v23  ;;  %414 = vmatpush1.bf16.msra.mxu1 %v1591_v24 }
  0x55   :  { %374 = vmatprep.subr.bf16.mxu0 %v1595_v25  ;;  %415 = vmatprep.subr.bf16.mxu1 %v1597_v26 }
  0x58   :  { %375 = vmatpush1.bf16.msra.mxu0 %v1601_v27  ;;  %416 = vmatpush1.bf16.msra.mxu1 %v1603_v28 }
  0x59   :  { %376 = vmatprep.subr.bf16.mxu0 %v1607_v29  ;;  %417 = vmatprep.subr.bf16.mxu1 %v1609_v30 }
  0x5c   :  { %377 = vmatpush1.bf16.msra.mxu0 %v1613_v31  ;;  %418 = vmatpush1.bf16.msra.mxu1 %v1615_v32 }
  0x5d   :  { %490 = vmatprep.subr.bf16.mxu0 %v1525_v1  ;;  %531 = vmatprep.subr.bf16.mxu1 %v1527_v2 }
  0xff   :  { %v268_v38 = vpop.f32.mrf.mxu0  ;;  %v309_v39 = vpop.f32.mrf.mxu1 }
 0x101   :  { %v270_v41 = vpop.f32.mrf.mxu0  ;;  %v311_v42 = vpop.f32.mrf.mxu1 }
 0x102   :  { %v320_v43 = vcombine.low %v268_v38, %v270_v41  ;;  %v321_v44 = vcombine.low %v309_v39, %v311_v42 }
 0x103   :  { %v272_v45 = vpop.f32.mrf.mxu0  ;;  %v313_v46 = vpop.f32.mrf.mxu1 }
 0x104   :  { %v328_v47 = vrot.slane %v320_v43, %v1659_v40  ;;  %v335_v48 = vrot.slane %v321_v44, %v1659_v40 }
 0x105   :  { %v273_v50 = vpop.f32.mrf.mxu0  ;;  %v314_v51 = vpop.f32.mrf.mxu1 }
 0x106   :  { %v336_v52 = vcombine.low %v328_v47, %v335_v48 }
 0x108   :  { %v338_v53 = vadd.f32 %v336_v52, %v73_v49  ;;  %v360_v49 = vld [vmem:[#allocation2 + $0x8] sm:$0xff] }
 0x10a   :  { %v1304_v54 = vmul.f32 -1.442695, %v338_v53 }
 0x10c   :  { %1377 = vpow2.f32 %v1304_v54 }
 0x119   :  { %v1378_v55 = vpop.eup %1377 }
 0x11a   :  { %v342_v56 = vadd.f32 1.0, %v1378_v55 }
 0x11c   :  { %1379 = vrcp.f32 %v342_v56 }
 0x129   :  { %v1380_v57 = vpop.eup %1379 }
 0x12a   :  { %v346_v58 = vrot.slane %v1380_v57, 4  ;;  %v350_v60 = vrot.slane %v1380_v57, 2  ;;  %v356_v34 = vrot.slane %v1380_v57, 6 }
 0x12c   :  { %v348_v59 = vmul.f32 2.0, %v346_v58  ;;  %v352_v62 = vmul.f32 0.0, %v350_v60 }
 0x12e   :  { %v1305_v61 = vadd.f32 -1.0, %v348_v59 }
 0x130   :  { %v353_v63 = vmul.f32 %v1380_v57, %v1305_v61 }
 0x132   :  { %v1663_v33 = vadd.f32 %v353_v63, %v352_v62 }
 0x134   :  { %1381 = vtanh.f32 %v1663_v33 }
 0x141   :  { %v1382_v35 = vpop.eup %1381 }
 0x142   :  { %v358_v36 = vmul.f32 %v1382_v35, %v356_v34 }
 0x144   :  { %v361_v37 = vpack.c.bf16 %v358_v36, %v358_v36 }
 0x146   :  { %395 = vmatmul.mubr.bf16.vlgmr.msra.gmra.mxu0 %v361_v37  ;;  %436 = vmatmul.mubr.bf16.vlgmr.msra.gmra.mxu1 %v361_v37 }
 0x147   :  { %491 = vmatpush1.bf16.msra.mxu0 %v1530_v3  ;;  %532 = vmatpush1.bf16.msra.mxu1 %v1532_v4 }
 0x148   :  { %492 = vmatprep.subr.bf16.mxu0 %v1535_v5  ;;  %533 = vmatprep.subr.bf16.mxu1 %v1539_v6 }
 0x149   :  { %522 = vmatprep.mubr.bf16.mxu0 %v1499_v0  ;;  %563 = vmatprep.mubr.bf16.mxu1 %v1499_v0 }
 0x14b   :  { %493 = vmatpush1.bf16.msra.mxu0 %v1541_v7  ;;  %534 = vmatpush1.bf16.msra.mxu1 %v1544_v8 }
 0x14c   :  { %494 = vmatprep.subr.bf16.mxu0 %v1547_v9  ;;  %535 = vmatprep.subr.bf16.mxu1 %v1549_v10 }
 0x14f   :  { %495 = vmatpush1.bf16.msra.mxu0 %v1551_v11  ;;  %536 = vmatpush1.bf16.msra.mxu1 %v1553_v12 }
 0x150   :  { %496 = vmatprep.subr.bf16.mxu0 %v1557_v13  ;;  %537 = vmatprep.subr.bf16.mxu1 %v1561_v14 }
 0x153   :  { %497 = vmatpush1.bf16.msra.mxu0 %v1563_v15  ;;  %538 = vmatpush1.bf16.msra.mxu1 %v1567_v16 }
 0x154   :  { %498 = vmatprep.subr.bf16.mxu0 %v1569_v17  ;;  %539 = vmatprep.subr.bf16.mxu1 %v1573_v18 }
 0x157   :  { %499 = vmatpush1.bf16.msra.mxu0 %v1575_v19  ;;  %540 = vmatpush1.bf16.msra.mxu1 %v1577_v20 }
 0x158   :  { %500 = vmatprep.subr.bf16.mxu0 %v1581_v21  ;;  %541 = vmatprep.subr.bf16.mxu1 %v1585_v22 }
 0x15b   :  { %501 = vmatpush1.bf16.msra.mxu0 %v1589_v23  ;;  %542 = vmatpush1.bf16.msra.mxu1 %v1591_v24 }
 0x15c   :  { %502 = vmatprep.subr.bf16.mxu0 %v1595_v25  ;;  %543 = vmatprep.subr.bf16.mxu1 %v1597_v26 }
 0x15f   :  { %503 = vmatpush1.bf16.msra.mxu0 %v1601_v27  ;;  %544 = vmatpush1.bf16.msra.mxu1 %v1603_v28 }
 0x160   :  { %504 = vmatprep.subr.bf16.mxu0 %v1607_v29  ;;  %545 = vmatprep.subr.bf16.mxu1 %v1609_v30 }
 0x163   :  { %505 = vmatpush1.bf16.msra.mxu0 %v1613_v31  ;;  %546 = vmatpush1.bf16.msra.mxu1 %v1615_v32 }
 0x164   :  { %618 = vmatprep.subr.bf16.mxu0 %v1525_v1  ;;  %659 = vmatprep.subr.bf16.mxu1 %v1527_v2 }
 0x206   :  { %v396_v38 = vpop.f32.mrf.mxu0  ;;  %v437_v39 = vpop.f32.mrf.mxu1 }
 0x208   :  { %v398_v41 = vpop.f32.mrf.mxu0  ;;  %v439_v42 = vpop.f32.mrf.mxu1 }
 0x209   :  { %v448_v43 = vcombine.low %v396_v38, %v398_v41  ;;  %v449_v44 = vcombine.low %v437_v39, %v439_v42 }
 0x20a   :  { %v400_v45 = vpop.f32.mrf.mxu0  ;;  %v441_v46 = vpop.f32.mrf.mxu1 }
 0x20b   :  { %v456_v47 = vrot.slane %v448_v43, %v1659_v40  ;;  %v463_v48 = vrot.slane %v449_v44, %v1659_v40 }
 0x20c   :  { %v401_v50 = vpop.f32.mrf.mxu0  ;;  %v442_v51 = vpop.f32.mrf.mxu1 }
 0x20d   :  { %v464_v52 = vcombine.low %v456_v47, %v463_v48 }
 0x20f   :  { %v466_v53 = vadd.f32 %v464_v52, %v360_v49  ;;  %v488_v49 = vld [vmem:[#allocation2 + $0x10] sm:$0xff] }
 0x211   :  { %v1306_v54 = vmul.f32 -1.442695, %v466_v53 }
 0x213   :  { %1383 = vpow2.f32 %v1306_v54 }
 0x220   :  { %v1384_v55 = vpop.eup %1383 }
 0x221   :  { %v470_v56 = vadd.f32 1.0, %v1384_v55 }
 0x223   :  { %1385 = vrcp.f32 %v470_v56 }
 0x230   :  { %v1386_v57 = vpop.eup %1385 }
 0x231   :  { %v474_v58 = vrot.slane %v1386_v57, 4  ;;  %v478_v60 = vrot.slane %v1386_v57, 2  ;;  %v484_v35 = vrot.slane %v1386_v57, 6 }
 0x233   :  { %v476_v59 = vmul.f32 2.0, %v474_v58  ;;  %v480_v62 = vmul.f32 %v478_v60, %v1663_v33 }
 0x235   :  { %v1307_v61 = vadd.f32 -1.0, %v476_v59 }
 0x237   :  { %v481_v63 = vmul.f32 %v1386_v57, %v1307_v61 }
 0x239   :  { %v1703_v34 = vadd.f32 %v481_v63, %v480_v62 }
 0x23b   :  { %1387 = vtanh.f32 %v1703_v34 }
 0x248   :  { %v1388_v36 = vpop.eup %1387 }
 0x249   :  { %v486_v37 = vmul.f32 %v1388_v36, %v484_v35 }
 0x24b   :  { %v489_v38 = vpack.c.bf16 %v486_v37, %v486_v37 }
 0x24d   :  { %523 = vmatmul.mubr.bf16.vlgmr.msra.gmra.mxu0 %v489_v38  ;;  %564 = vmatmul.mubr.bf16.vlgmr.msra.gmra.mxu1 %v489_v38 }
 0x24e   :  { %619 = vmatpush1.bf16.msra.mxu0 %v1530_v3  ;;  %660 = vmatpush1.bf16.msra.mxu1 %v1532_v4 }
 0x24f   :  { %620 = vmatprep.subr.bf16.mxu0 %v1535_v5  ;;  %661 = vmatprep.subr.bf16.mxu1 %v1539_v6 }
 0x250   :  { %650 = vmatprep.mubr.bf16.mxu0 %v1499_v0  ;;  %691 = vmatprep.mubr.bf16.mxu1 %v1499_v0 }
 0x252   :  { %621 = vmatpush1.bf16.msra.mxu0 %v1541_v7  ;;  %662 = vmatpush1.bf16.msra.mxu1 %v1544_v8 }
 0x253   :  { %622 = vmatprep.subr.bf16.mxu0 %v1547_v9  ;;  %663 = vmatprep.subr.bf16.mxu1 %v1549_v10 }
 0x256   :  { %623 = vmatpush1.bf16.msra.mxu0 %v1551_v11  ;;  %664 = vmatpush1.bf16.msra.mxu1 %v1553_v12 }
 0x257   :  { %624 = vmatprep.subr.bf16.mxu0 %v1557_v13  ;;  %665 = vmatprep.subr.bf16.mxu1 %v1561_v14 }
 0x25a   :  { %625 = vmatpush1.bf16.msra.mxu0 %v1563_v15  ;;  %666 = vmatpush1.bf16.msra.mxu1 %v1567_v16 }
 0x25b   :  { %626 = vmatprep.subr.bf16.mxu0 %v1569_v17  ;;  %667 = vmatprep.subr.bf16.mxu1 %v1573_v18 }
 0x25e   :  { %627 = vmatpush1.bf16.msra.mxu0 %v1575_v19  ;;  %668 = vmatpush1.bf16.msra.mxu1 %v1577_v20 }
 0x25f   :  { %628 = vmatprep.subr.bf16.mxu0 %v1581_v21  ;;  %669 = vmatprep.subr.bf16.mxu1 %v1585_v22 }
 0x262   :  { %629 = vmatpush1.bf16.msra.mxu0 %v1589_v23  ;;  %670 = vmatpush1.bf16.msra.mxu1 %v1591_v24 }
 0x263   :  { %630 = vmatprep.subr.bf16.mxu0 %v1595_v25  ;;  %671 = vmatprep.subr.bf16.mxu1 %v1597_v26 }
 0x266   :  { %631 = vmatpush1.bf16.msra.mxu0 %v1601_v27  ;;  %672 = vmatpush1.bf16.msra.mxu1 %v1603_v28 }
 0x267   :  { %632 = vmatprep.subr.bf16.mxu0 %v1607_v29  ;;  %673 = vmatprep.subr.bf16.mxu1 %v1609_v30 }
 0x26a   :  { %633 = vmatpush1.bf16.msra.mxu0 %v1613_v31  ;;  %674 = vmatpush1.bf16.msra.mxu1 %v1615_v32 }
 0x26b   :  { %746 = vmatprep.subr.bf16.mxu0 %v1525_v1  ;;  %787 = vmatprep.subr.bf16.mxu1 %v1527_v2 }
 0x30d   :  { %v524_v33 = vpop.f32.mrf.mxu0  ;;  %v565_v39 = vpop.f32.mrf.mxu1 }
 0x30f   :  { %v526_v41 = vpop.f32.mrf.mxu0  ;;  %v567_v42 = vpop.f32.mrf.mxu1 }
 0x310   :  { %v576_v43 = vcombine.low %v524_v33, %v526_v41  ;;  %v577_v44 = vcombine.low %v565_v39, %v567_v42 }
 0x311   :  { %v528_v45 = vpop.f32.mrf.mxu0  ;;  %v569_v46 = vpop.f32.mrf.mxu1 }
 0x312   :  { %v584_v47 = vrot.slane %v576_v43, %v1659_v40  ;;  %v591_v48 = vrot.slane %v577_v44, %v1659_v40 }
 0x313   :  { %v529_v50 = vpop.f32.mrf.mxu0  ;;  %v570_v51 = vpop.f32.mrf.mxu1 }
 0x314   :  { %v592_v52 = vcombine.low %v584_v47, %v591_v48 }
 0x316   :  { %v594_v53 = vadd.f32 %v592_v52, %v488_v49  ;;  %v616_v49 = vld [vmem:[#allocation2 + $0x18] sm:$0xff] }
 0x318   :  { %v1308_v54 = vmul.f32 -1.442695, %v594_v53 }
 0x31a   :  { %1389 = vpow2.f32 %v1308_v54 }
 0x327   :  { %v1390_v55 = vpop.eup %1389 }
 0x328   :  { %v598_v56 = vadd.f32 1.0, %v1390_v55 }
 0x32a   :  { %1391 = vrcp.f32 %v598_v56 }
 0x337   :  { %v1392_v57 = vpop.eup %1391 }
 0x338   :  { %v602_v58 = vrot.slane %v1392_v57, 4  ;;  %v606_v60 = vrot.slane %v1392_v57, 2  ;;  %v612_v36 = vrot.slane %v1392_v57, 6 }
 0x33a   :  { %v604_v59 = vmul.f32 2.0, %v602_v58  ;;  %v608_v62 = vmul.f32 %v606_v60, %v1703_v34 }
 0x33c   :  { %v1309_v61 = vadd.f32 -1.0, %v604_v59 }
 0x33e   :  { %v609_v63 = vmul.f32 %v1392_v57, %v1309_v61 }
 0x340   :  { %v1743_v35 = vadd.f32 %v609_v63, %v608_v62 }
 0x342   :  { %1393 = vtanh.f32 %v1743_v35 }
 0x34f   :  { %v1394_v37 = vpop.eup %1393 }
 0x350   :  { %v614_v38 = vmul.f32 %v1394_v37, %v612_v36 }
 0x352   :  { %v617_v33 = vpack.c.bf16 %v614_v38, %v614_v38 }
 0x354   :  { %651 = vmatmul.mubr.bf16.vlgmr.msra.gmra.mxu0 %v617_v33  ;;  %692 = vmatmul.mubr.bf16.vlgmr.msra.gmra.mxu1 %v617_v33 }
 0x355   :  { %747 = vmatpush1.bf16.msra.mxu0 %v1530_v3  ;;  %788 = vmatpush1.bf16.msra.mxu1 %v1532_v4 }
 0x356   :  { %748 = vmatprep.subr.bf16.mxu0 %v1535_v5  ;;  %789 = vmatprep.subr.bf16.mxu1 %v1539_v6 }
 0x357   :  { %778 = vmatprep.mubr.bf16.mxu0 %v1499_v0  ;;  %819 = vmatprep.mubr.bf16.mxu1 %v1499_v0 }
 0x359   :  { %749 = vmatpush1.bf16.msra.mxu0 %v1541_v7  ;;  %790 = vmatpush1.bf16.msra.mxu1 %v1544_v8 }
 0x35a   :  { %750 = vmatprep.subr.bf16.mxu0 %v1547_v9  ;;  %791 = vmatprep.subr.bf16.mxu1 %v1549_v10 }
 0x35d   :  { %751 = vmatpush1.bf16.msra.mxu0 %v1551_v11  ;;  %792 = vmatpush1.bf16.msra.mxu1 %v1553_v12 }
 0x35e   :  { %752 = vmatprep.subr.bf16.mxu0 %v1557_v13  ;;  %793 = vmatprep.subr.bf16.mxu1 %v1561_v14 }
 0x361   :  { %753 = vmatpush1.bf16.msra.mxu0 %v1563_v15  ;;  %794 = vmatpush1.bf16.msra.mxu1 %v1567_v16 }
 0x362   :  { %754 = vmatprep.subr.bf16.mxu0 %v1569_v17  ;;  %795 = vmatprep.subr.bf16.mxu1 %v1573_v18 }
 0x365   :  { %755 = vmatpush1.bf16.msra.mxu0 %v1575_v19  ;;  %796 = vmatpush1.bf16.msra.mxu1 %v1577_v20 }
 0x366   :  { %756 = vmatprep.subr.bf16.mxu0 %v1581_v21  ;;  %797 = vmatprep.subr.bf16.mxu1 %v1585_v22 }
 0x369   :  { %757 = vmatpush1.bf16.msra.mxu0 %v1589_v23  ;;  %798 = vmatpush1.bf16.msra.mxu1 %v1591_v24 }
 0x36a   :  { %758 = vmatprep.subr.bf16.mxu0 %v1595_v25  ;;  %799 = vmatprep.subr.bf16.mxu1 %v1597_v26 }
 0x36d   :  { %759 = vmatpush1.bf16.msra.mxu0 %v1601_v27  ;;  %800 = vmatpush1.bf16.msra.mxu1 %v1603_v28 }
 0x36e   :  { %760 = vmatprep.subr.bf16.mxu0 %v1607_v29  ;;  %801 = vmatprep.subr.bf16.mxu1 %v1609_v30 }
 0x371   :  { %761 = vmatpush1.bf16.msra.mxu0 %v1613_v31  ;;  %802 = vmatpush1.bf16.msra.mxu1 %v1615_v32 }
 0x372   :  { %874 = vmatprep.subr.bf16.mxu0 %v1525_v1  ;;  %915 = vmatprep.subr.bf16.mxu1 %v1527_v2 }
 0x414   :  { %v652_v34 = vpop.f32.mrf.mxu0  ;;  %v693_v39 = vpop.f32.mrf.mxu1 }
 0x416   :  { %v654_v41 = vpop.f32.mrf.mxu0  ;;  %v695_v42 = vpop.f32.mrf.mxu1 }
 0x417   :  { %v704_v43 = vcombine.low %v652_v34, %v654_v41  ;;  %v705_v44 = vcombine.low %v693_v39, %v695_v42 }
 0x418   :  { %v656_v45 = vpop.f32.mrf.mxu0  ;;  %v697_v46 = vpop.f32.mrf.mxu1 }
 0x419   :  { %v712_v47 = vrot.slane %v704_v43, %v1659_v40  ;;  %v719_v48 = vrot.slane %v705_v44, %v1659_v40 }
 0x41a   :  { %v657_v50 = vpop.f32.mrf.mxu0  ;;  %v698_v51 = vpop.f32.mrf.mxu1 }
 0x41b   :  { %v720_v52 = vcombine.low %v712_v47, %v719_v48 }
 0x41d   :  { %v722_v53 = vadd.f32 %v720_v52, %v616_v49  ;;  %v744_v49 = vld [vmem:[#allocation2 + $0x20] sm:$0xff] }
 0x41f   :  { %v1310_v54 = vmul.f32 -1.442695, %v722_v53 }
 0x421   :  { %1395 = vpow2.f32 %v1310_v54 }
 0x42e   :  { %v1396_v55 = vpop.eup %1395 }
 0x42f   :  { %v726_v56 = vadd.f32 1.0, %v1396_v55 }
 0x431   :  { %1397 = vrcp.f32 %v726_v56 }
 0x43e   :  { %v1398_v57 = vpop.eup %1397 }
 0x43f   :  { %v730_v58 = vrot.slane %v1398_v57, 4  ;;  %v734_v60 = vrot.slane %v1398_v57, 2  ;;  %v740_v37 = vrot.slane %v1398_v57, 6 }
 0x441   :  { %v732_v59 = vmul.f32 2.0, %v730_v58  ;;  %v736_v62 = vmul.f32 %v734_v60, %v1743_v35 }
 0x443   :  { %v1311_v61 = vadd.f32 -1.0, %v732_v59 }
 0x445   :  { %v737_v63 = vmul.f32 %v1398_v57, %v1311_v61 }
 0x447   :  { %v1783_v36 = vadd.f32 %v737_v63, %v736_v62 }
 0x449   :  { %1399 = vtanh.f32 %v1783_v36 }
 0x456   :  { %v1400_v38 = vpop.eup %1399 }
 0x457   :  { %v742_v33 = vmul.f32 %v1400_v38, %v740_v37 }
 0x459   :  { %v745_v34 = vpack.c.bf16 %v742_v33, %v742_v33 }
 0x45b   :  { %779 = vmatmul.mubr.bf16.vlgmr.msra.gmra.mxu0 %v745_v34  ;;  %820 = vmatmul.mubr.bf16.vlgmr.msra.gmra.mxu1 %v745_v34 }
 0x45c   :  { %875 = vmatpush1.bf16.msra.mxu0 %v1530_v3  ;;  %916 = vmatpush1.bf16.msra.mxu1 %v1532_v4 }
 0x45d   :  { %876 = vmatprep.subr.bf16.mxu0 %v1535_v5  ;;  %917 = vmatprep.subr.bf16.mxu1 %v1539_v6 }
 0x45e   :  { %906 = vmatprep.mubr.bf16.mxu0 %v1499_v0  ;;  %947 = vmatprep.mubr.bf16.mxu1 %v1499_v0 }
 0x460   :  { %877 = vmatpush1.bf16.msra.mxu0 %v1541_v7  ;;  %918 = vmatpush1.bf16.msra.mxu1 %v1544_v8 }
 0x461   :  { %878 = vmatprep.subr.bf16.mxu0 %v1547_v9  ;;  %919 = vmatprep.subr.bf16.mxu1 %v1549_v10 }
 0x464   :  { %879 = vmatpush1.bf16.msra.mxu0 %v1551_v11  ;;  %920 = vmatpush1.bf16.msra.mxu1 %v1553_v12 }
 0x465   :  { %880 = vmatprep.subr.bf16.mxu0 %v1557_v13  ;;  %921 = vmatprep.subr.bf16.mxu1 %v1561_v14 }
 0x468   :  { %881 = vmatpush1.bf16.msra.mxu0 %v1563_v15  ;;  %922 = vmatpush1.bf16.msra.mxu1 %v1567_v16 }
 0x469   :  { %882 = vmatprep.subr.bf16.mxu0 %v1569_v17  ;;  %923 = vmatprep.subr.bf16.mxu1 %v1573_v18 }
 0x46c   :  { %883 = vmatpush1.bf16.msra.mxu0 %v1575_v19  ;;  %924 = vmatpush1.bf16.msra.mxu1 %v1577_v20 }
 0x46d   :  { %884 = vmatprep.subr.bf16.mxu0 %v1581_v21  ;;  %925 = vmatprep.subr.bf16.mxu1 %v1585_v22 }
 0x470   :  { %885 = vmatpush1.bf16.msra.mxu0 %v1589_v23  ;;  %926 = vmatpush1.bf16.msra.mxu1 %v1591_v24 }
 0x471   :  { %886 = vmatprep.subr.bf16.mxu0 %v1595_v25  ;;  %927 = vmatprep.subr.bf16.mxu1 %v1597_v26 }
 0x474   :  { %887 = vmatpush1.bf16.msra.mxu0 %v1601_v27  ;;  %928 = vmatpush1.bf16.msra.mxu1 %v1603_v28 }
 0x475   :  { %888 = vmatprep.subr.bf16.mxu0 %v1607_v29  ;;  %929 = vmatprep.subr.bf16.mxu1 %v1609_v30 }
 0x478   :  { %889 = vmatpush1.bf16.msra.mxu0 %v1613_v31  ;;  %930 = vmatpush1.bf16.msra.mxu1 %v1615_v32 }
 0x479   :  { %1002 = vmatprep.subr.bf16.mxu0 %v1525_v1  ;;  %1043 = vmatprep.subr.bf16.mxu1 %v1527_v2 }
 0x51b   :  { %v780_v35 = vpop.f32.mrf.mxu0  ;;  %v821_v39 = vpop.f32.mrf.mxu1 }
 0x51d   :  { %v782_v41 = vpop.f32.mrf.mxu0  ;;  %v823_v42 = vpop.f32.mrf.mxu1 }
 0x51e   :  { %v832_v43 = vcombine.low %v780_v35, %v782_v41  ;;  %v833_v44 = vcombine.low %v821_v39, %v823_v42 }
 0x51f   :  { %v784_v45 = vpop.f32.mrf.mxu0  ;;  %v825_v46 = vpop.f32.mrf.mxu1 }
 0x520   :  { %v840_v47 = vrot.slane %v832_v43, %v1659_v40  ;;  %v847_v48 = vrot.slane %v833_v44, %v1659_v40 }
 0x521   :  { %v785_v50 = vpop.f32.mrf.mxu0  ;;  %v826_v51 = vpop.f32.mrf.mxu1 }
 0x522   :  { %v848_v52 = vcombine.low %v840_v47, %v847_v48  ;;  %v872_v47 = vld [vmem:[#allocation2 + $0x28] sm:$0xff] }
 0x524   :  { %v850_v53 = vadd.f32 %v848_v52, %v744_v49 }
 0x526   :  { %v1312_v54 = vmul.f32 -1.442695, %v850_v53 }
 0x528   :  { %1401 = vpow2.f32 %v1312_v54 }
 0x535   :  { %v1402_v55 = vpop.eup %1401 }
 0x536   :  { %v854_v56 = vadd.f32 1.0, %v1402_v55 }
 0x538   :  { %1403 = vrcp.f32 %v854_v56 }
 0x545   :  { %v1404_v57 = vpop.eup %1403 }
 0x546   :  { %v858_v58 = vrot.slane %v1404_v57, 4  ;;  %v862_v60 = vrot.slane %v1404_v57, 2  ;;  %v868_v38 = vrot.slane %v1404_v57, 6 }
 0x548   :  { %v860_v59 = vmul.f32 2.0, %v858_v58  ;;  %v864_v62 = vmul.f32 %v862_v60, %v1783_v36 }
 0x54a   :  { %v1313_v61 = vadd.f32 -1.0, %v860_v59 }
 0x54c   :  { %v865_v63 = vmul.f32 %v1404_v57, %v1313_v61 }
 0x54e   :  { %v1823_v37 = vadd.f32 %v865_v63, %v864_v62 }
 0x550   :  { %1405 = vtanh.f32 %v1823_v37 }
 0x55d   :  { %v1406_v33 = vpop.eup %1405 }
 0x55e   :  { %v870_v34 = vmul.f32 %v1406_v33, %v868_v38  ;;  %v1425_v33 = vld [vmem:[#allocation5 + $0xe0] ss:$16 sps:$4 sm:$0xff]  }
 0x560   :  { %v873_v35 = vpack.c.bf16 %v870_v34, %v870_v34  ;;  %v1426_v34 = vld [vmem:[#allocation5 + $0xe8] ss:$16 sps:$4 sm:$0xff]  }
 0x562   :  { %907 = vmatmul.mubr.bf16.vlgmr.msra.gmra.mxu0 %v873_v35  ;;  %948 = vmatmul.mubr.bf16.vlgmr.msra.gmra.mxu1 %v873_v35 }
 0x563   :  { %1003 = vmatpush1.bf16.msra.mxu0 %v1530_v3  ;;  %1044 = vmatpush1.bf16.msra.mxu1 %v1532_v4 }
 0x564   :  { %1004 = vmatprep.subr.bf16.mxu0 %v1535_v5  ;;  %1045 = vmatprep.subr.bf16.mxu1 %v1539_v6 }
 0x565   :  { %1034 = vmatprep.mubr.bf16.mxu0 %v1499_v0  ;;  %1075 = vmatprep.mubr.bf16.mxu1 %v1499_v0 }
 0x567   :  { %1005 = vmatpush1.bf16.msra.mxu0 %v1541_v7  ;;  %1046 = vmatpush1.bf16.msra.mxu1 %v1544_v8 }
 0x568   :  { %1006 = vmatprep.subr.bf16.mxu0 %v1547_v9  ;;  %1047 = vmatprep.subr.bf16.mxu1 %v1549_v10 }
 0x56b   :  { %1007 = vmatpush1.bf16.msra.mxu0 %v1551_v11  ;;  %1048 = vmatpush1.bf16.msra.mxu1 %v1553_v12 }
 0x56c   :  { %1008 = vmatprep.subr.bf16.mxu0 %v1557_v13  ;;  %1049 = vmatprep.subr.bf16.mxu1 %v1561_v14 }
 0x56f   :  { %1009 = vmatpush1.bf16.msra.mxu0 %v1563_v15  ;;  %1050 = vmatpush1.bf16.msra.mxu1 %v1567_v16 }
 0x570   :  { %1010 = vmatprep.subr.bf16.mxu0 %v1569_v17  ;;  %1051 = vmatprep.subr.bf16.mxu1 %v1573_v18 }
 0x573   :  { %1011 = vmatpush1.bf16.msra.mxu0 %v1575_v19  ;;  %1052 = vmatpush1.bf16.msra.mxu1 %v1577_v20 }
 0x574   :  { %1012 = vmatprep.subr.bf16.mxu0 %v1581_v21  ;;  %1053 = vmatprep.subr.bf16.mxu1 %v1585_v22 }
 0x577   :  { %1013 = vmatpush1.bf16.msra.mxu0 %v1589_v23  ;;  %1054 = vmatpush1.bf16.msra.mxu1 %v1591_v24 }
 0x578   :  { %1014 = vmatprep.subr.bf16.mxu0 %v1595_v25  ;;  %1055 = vmatprep.subr.bf16.mxu1 %v1597_v26 }
 0x57b   :  { %1015 = vmatpush1.bf16.msra.mxu0 %v1601_v27  ;;  %1056 = vmatpush1.bf16.msra.mxu1 %v1603_v28 }
 0x57c   :  { %1016 = vmatprep.subr.bf16.mxu0 %v1607_v29  ;;  %1057 = vmatprep.subr.bf16.mxu1 %v1609_v30 }
 0x57f   :  { %1017 = vmatpush1.bf16.msra.mxu0 %v1613_v31  ;;  %1058 = vmatpush1.bf16.msra.mxu1 %v1615_v32 }
 0x580   :  { %1130 = vmatprep.subr.bf16.mxu0 %v1525_v1  ;;  %1171 = vmatprep.subr.bf16.mxu1 %v1527_v2 }
 0x622   :  { %v908_v3 = vpop.f32.mrf.mxu0  ;;  %v949_v4 = vpop.f32.mrf.mxu1 }
 0x624   :  { %v910_v36 = vpop.f32.mrf.mxu0  ;;  %v951_v39 = vpop.f32.mrf.mxu1 }
 0x625   :  { %v960_v41 = vcombine.low %v908_v3, %v910_v36  ;;  %v961_v42 = vcombine.low %v949_v4, %v951_v39 }
 0x626   :  { %v912_v43 = vpop.f32.mrf.mxu0  ;;  %v953_v44 = vpop.f32.mrf.mxu1 }
 0x627   :  { %v968_v45 = vrot.slane %v960_v41, %v1659_v40  ;;  %v975_v46 = vrot.slane %v961_v42, %v1659_v40 }
 0x628   :  { %v913_v48 = vpop.f32.mrf.mxu0  ;;  %v954_v49 = vpop.f32.mrf.mxu1 }
 0x629   :  { %v976_v50 = vcombine.low %v968_v45, %v975_v46  ;;  %v1128_v46 = vld [vmem:[#allocation2 + $0x38] sm:$0xff] }
 0x62b   :  { %v978_v51 = vadd.f32 %v976_v50, %v872_v47 }
 0x62d   :  { %v1314_v1 = vmul.f32 -1.442695, %v978_v51 }
 0x62f   :  { %1407 = vpow2.f32 %v1314_v1 }
 0x63c   :  { %v1408_v2 = vpop.eup %1407 }
 0x63d   :  { %v982_v52 = vadd.f32 1.0, %v1408_v2 }
 0x63f   :  { %1409 = vrcp.f32 %v982_v52 }
 0x64c   :  { %v1410_v53 = vpop.eup %1409 }
 0x64d   :  { %v986_v54 = vrot.slane %v1410_v53, 4  ;;  %v990_v56 = vrot.slane %v1410_v53, 2  ;;  %v996_v61 = vrot.slane %v1410_v53, 6 }
 0x64f   :  { %v988_v55 = vmul.f32 2.0, %v986_v54  ;;  %v992_v58 = vmul.f32 %v990_v56, %v1823_v37 }
 0x651   :  { %v1315_v57 = vadd.f32 -1.0, %v988_v55 }
 0x653   :  { %v993_v59 = vmul.f32 %v1410_v53, %v1315_v57 }
 0x655   :  { %v1863_v60 = vadd.f32 %v993_v59, %v992_v58 }
 0x657   :  { %1411 = vtanh.f32 %v1863_v60 }
 0x664   :  { %v1412_v62 = vpop.eup %1411 }
 0x665   :  { %v998_v63 = vmul.f32 %v1412_v62, %v996_v61 }
 0x667   :  { %v1001_v38 = vpack.c.bf16 %v998_v63, %v998_v63 }
 0x669   :  { %1035 = vmatmul.mubr.bf16.vlgmr.msra.gmra.mxu0 %v1001_v38  ;;  %1076 = vmatmul.mubr.bf16.vlgmr.msra.gmra.mxu1 %v1001_v38 }
 0x66a   :  { %1131 = vmatpush1.bf16.msra.mxu0 %v1425_v33  ;;  %1172 = vmatpush1.bf16.msra.mxu1 %v1426_v34 }
 0x66b   :  { %1132 = vmatprep.subr.bf16.mxu0 %v1535_v5  ;;  %1173 = vmatprep.subr.bf16.mxu1 %v1539_v6 }
 0x66c   :  { %1162 = vmatprep.mubr.bf16.mxu0 %v1499_v0  ;;  %1203 = vmatprep.mubr.bf16.mxu1 %v1499_v0 }
 0x66e   :  { %1133 = vmatpush1.bf16.msra.mxu0 %v1541_v7  ;;  %1174 = vmatpush1.bf16.msra.mxu1 %v1544_v8 }
 0x66f   :  { %1134 = vmatprep.subr.bf16.mxu0 %v1547_v9  ;;  %1175 = vmatprep.subr.bf16.mxu1 %v1549_v10 }
 0x672   :  { %1135 = vmatpush1.bf16.msra.mxu0 %v1551_v11  ;;  %1176 = vmatpush1.bf16.msra.mxu1 %v1553_v12 }
 0x673   :  { %1136 = vmatprep.subr.bf16.mxu0 %v1557_v13  ;;  %1177 = vmatprep.subr.bf16.mxu1 %v1561_v14  ;;  %v1000_v14 = vld [vmem:[#allocation2 + $0x30] sm:$0xff] }
 0x676   :  { %1137 = vmatpush1.bf16.msra.mxu0 %v1563_v15  ;;  %1178 = vmatpush1.bf16.msra.mxu1 %v1567_v16 }
 0x677   :  { %1138 = vmatprep.subr.bf16.mxu0 %v1569_v17  ;;  %1179 = vmatprep.subr.bf16.mxu1 %v1573_v18 }
 0x67a   :  { %1139 = vmatpush1.bf16.msra.mxu0 %v1575_v19  ;;  %1180 = vmatpush1.bf16.msra.mxu1 %v1577_v20 }
 0x67b   :  { %1140 = vmatprep.subr.bf16.mxu0 %v1581_v21  ;;  %1181 = vmatprep.subr.bf16.mxu1 %v1585_v22 }
 0x67e   :  { %1141 = vmatpush1.bf16.msra.mxu0 %v1589_v23  ;;  %1182 = vmatpush1.bf16.msra.mxu1 %v1591_v24 }
 0x67f   :  { %1142 = vmatprep.subr.bf16.mxu0 %v1595_v25  ;;  %1183 = vmatprep.subr.bf16.mxu1 %v1597_v26 }
 0x682   :  { %1143 = vmatpush1.bf16.msra.mxu0 %v1601_v27  ;;  %1184 = vmatpush1.bf16.msra.mxu1 %v1603_v28 }
 0x683   :  { %1144 = vmatprep.subr.bf16.mxu0 %v1607_v29  ;;  %1185 = vmatprep.subr.bf16.mxu1 %v1609_v30 }
 0x686   :  { %1145 = vmatpush1.bf16.msra.mxu0 %v1613_v31  ;;  %1186 = vmatpush1.bf16.msra.mxu1 %v1615_v32 }
 0x729   :  { %v1036_v0 = vpop.f32.mrf.mxu0  ;;  %v1077_v5 = vpop.f32.mrf.mxu1 }
 0x72b   :  { %v1038_v6 = vpop.f32.mrf.mxu0  ;;  %v1079_v7 = vpop.f32.mrf.mxu1 }
 0x72c   :  { %v1088_v8 = vcombine.low %v1036_v0, %v1038_v6  ;;  %v1089_v9 = vcombine.low %v1077_v5, %v1079_v7 }
 0x72d   :  { %v1040_v10 = vpop.f32.mrf.mxu0  ;;  %v1081_v11 = vpop.f32.mrf.mxu1 }
 0x72e   :  { %v1096_v12 = vrot.slane %v1088_v8, %v1659_v40  ;;  %v1103_v13 = vrot.slane %v1089_v9, %v1659_v40 }
 0x72f   :  { %v1041_v15 = vpop.f32.mrf.mxu0  ;;  %v1082_v16 = vpop.f32.mrf.mxu1 }
 0x730   :  { %v1104_v17 = vcombine.low %v1096_v12, %v1103_v13 }
 0x732   :  { %v1106_v18 = vadd.f32 %v1104_v17, %v1000_v14 }
 0x734   :  { %v1316_v19 = vmul.f32 -1.442695, %v1106_v18 }
 0x736   :  { %1413 = vpow2.f32 %v1316_v19 }
 0x743   :  { %v1414_v20 = vpop.eup %1413 }
 0x744   :  { %v1110_v21 = vadd.f32 1.0, %v1414_v20 }
 0x746   :  { %1415 = vrcp.f32 %v1110_v21 }
 0x753   :  { %v1416_v22 = vpop.eup %1415 }
 0x754   :  { %v1114_v23 = vrot.slane %v1416_v22, 4  ;;  %v1118_v25 = vrot.slane %v1416_v22, 2  ;;  %v1124_v30 = vrot.slane %v1416_v22, 6 }
 0x756   :  { %v1116_v24 = vmul.f32 2.0, %v1114_v23  ;;  %v1120_v27 = vmul.f32 %v1118_v25, %v1863_v60 }
 0x758   :  { %v1317_v26 = vadd.f32 -1.0, %v1116_v24 }
 0x75a   :  { %v1121_v28 = vmul.f32 %v1416_v22, %v1317_v26 }
 0x75c   :  { %v1122_v29 = vadd.f32 %v1121_v28, %v1120_v27 }
 0x75e   :  { %1417 = vtanh.f32 %v1122_v29 }
 0x76b   :  { %v1418_v31 = vpop.eup %1417 }
 0x76c   :  { %v1126_v32 = vmul.f32 %v1418_v31, %v1124_v30 }
 0x76e   :  { %v1129_v37 = vpack.c.bf16 %v1126_v32, %v1126_v32 }
 0x770   :  { %1163 = vmatmul.mubr.bf16.vlgmr.msra.gmra.mxu0 %v1129_v37  ;;  %1204 = vmatmul.mubr.bf16.vlgmr.msra.gmra.mxu1 %v1129_v37 }
 0x830   :  { %v1164_v35 = vpop.f32.mrf.mxu0  ;;  %v1205_v3 = vpop.f32.mrf.mxu1 }
 0x832   :  { %v1166_v4 = vpop.f32.mrf.mxu0  ;;  %v1207_v36 = vpop.f32.mrf.mxu1 }
 0x833   :  { %v1216_v39 = vcombine.low %v1164_v35, %v1166_v4  ;;  %v1217_v41 = vcombine.low %v1205_v3, %v1207_v36 }
 0x834   :  { %v1168_v42 = vpop.f32.mrf.mxu0  ;;  %v1209_v43 = vpop.f32.mrf.mxu1 }
 0x835   :  { %v1224_v44 = vrot.slane %v1216_v39, %v1659_v40  ;;  %v1231_v45 = vrot.slane %v1217_v41, %v1659_v40 }
 0x836   :  { %v1169_v47 = vpop.f32.mrf.mxu0  ;;  %v1210_v48 = vpop.f32.mrf.mxu1 }
 0x837   :  { %v1232_v49 = vcombine.low %v1224_v44, %v1231_v45 }
 0x839   :  { %v1234_v50 = vadd.f32 %v1232_v49, %v1128_v46 }
 0x83b   :  { %v1318_v51 = vmul.f32 -1.442695, %v1234_v50 }
 0x83d   :  { %1419 = vpow2.f32 %v1318_v51 }
 0x84a   :  { %v1420_v1 = vpop.eup %1419 }
 0x84b   :  { %v1238_v2 = vadd.f32 1.0, %v1420_v1 }
 0x84d   :  { %1421 = vrcp.f32 %v1238_v2 }
 0x85a   :  { %v1422_v52 = vpop.eup %1421 }
 0x85b   :  { %v1242_v53 = vrot.slane %v1422_v52, 4  ;;  %v1246_v55 = vrot.slane %v1422_v52, 2  ;;  %v1252_v40 = vrot.slane %v1422_v52, 6 }
 0x85d   :  { %v1244_v54 = vmul.f32 2.0, %v1242_v53  ;;  %v1248_v57 = vmul.f32 %v1246_v55, %v1122_v29 }
 0x85f   :  { %v1319_v56 = vadd.f32 -1.0, %v1244_v54 }
 0x861   :  { %v1249_v58 = vmul.f32 %v1422_v52, %v1319_v56 }
 0x863   :  { %v1250_v59 = vadd.f32 %v1249_v58, %v1248_v57 }
 0x865   :  { %1423 = vtanh.f32 %v1250_v59 }
 0x872   :  { %v1424_v60 = vpop.eup %1423 }
 0x873   :  { %v1254_v61 = vmul.f32 %v1424_v60, %v1252_v40 }
 0x875   :  { %1255 = vst [vmem:[#allocation7] sm:$0x3] %v1254_v61 }
 0x876   :  { %1478 = shalt.err (!%p1475_p0)
}
 0x877   :  { %1265 = dma.vmem_to_hbm [thread:$0]  %s1263_s1, 32, %s1906_s2, [#allocation4]  }
 0x878   :  { %1491 = dma.done.wait [#allocation4], 32  }
 0x879   :  { %1492 = vsyncadd [#allocation4], 4294967264 }
 0x87a   :  { %1269 = vsyncpa [#allocation3], 1 }
 0x87b   :  { %1270 = vsyncpa [#allocation6], 1 }
 0x87c   :  { %1271 = vsyncpa [#allocation4], 1 }

</bundles_post_ra>
